<compile_context>
chip_gen: v5e
topology: v5e:2x2
jax: 0.10.0
libtpu: 0.0.40
codegen_flags: <defaults>
</compile_context>

<pallas_src>
import functools
import math

import jax
import jax.numpy as jnp
from jax.experimental import pallas as pl
from jax.experimental.pallas import tpu as pltpu


# --------------------------------------------------------------------------------------
# Kernels
# --------------------------------------------------------------------------------------
def _maybe_bf16(t, enable):
    # Feed the MXU bf16 operands when inputs are f32 (the MXU is bf16-native); the
    # accumulation stays f32 via preferred_element_type.
    if enable and t.dtype == jnp.float32:
        return t.astype(jnp.bfloat16)
    return t


def _linear_kernel_single_k(x_ref, w_ref, o_ref, *, bf16_mxu):
    # Whole contraction in one block: no accumulator scratch, write the result directly.
    a = _maybe_bf16(x_ref[...], bf16_mxu)
    b = _maybe_bf16(w_ref[...], bf16_mxu)
    o_ref[...] = jax.lax.dot_general(
        a, b,
        dimension_numbers=(((1,), (0,)), ((), ())),   # (bm, K) x (K, bn) -> (bm, bn)
        preferred_element_type=jnp.float32,
    ).astype(o_ref.dtype)


def _linear_kernel_multi_k(x_ref, w_ref, o_ref, acc_ref, *, bf16_mxu):
    k = pl.program_id(2)
    a = _maybe_bf16(x_ref[...], bf16_mxu)
    b = _maybe_bf16(w_ref[...], bf16_mxu)
    partial = jax.lax.dot_general(
        a, b,
        dimension_numbers=(((1,), (0,)), ((), ())),   # (bm, bk) x (bk, bn) -> (bm, bn)
        preferred_element_type=jnp.float32,
    )

    @pl.when(k == 0)
    def _():
        acc_ref[...] = partial          # store first partial: no zero-init + RMW pass

    @pl.when(k != 0)
    def _():
        acc_ref[...] += partial

    @pl.when(k == pl.num_programs(2) - 1)
    def _():
        o_ref[...] = acc_ref[...].astype(o_ref.dtype)


# --------------------------------------------------------------------------------------
# Tiling helpers
# --------------------------------------------------------------------------------------
def _vmem_capacity_bytes():
    try:
        cap = getattr(pltpu.get_tpu_info(), "vmem_capacity_bytes", None)
        if cap:
            return int(cap)
    except Exception:
        pass
    return 128 * 2 ** 20


def _pick_block(dim, target, align):
    """Largest multiple of `align` <= target that divides `dim`; None if none exists."""
    if dim % align:
        return None
    t = (min(target, dim) // align) * align
    while t >= align:
        if dim % t == 0:
            return t
        t -= align
    return None


def _block_and_pad(dim, target, aligns):
    """(block, padded_dim): full dim when small, else an aligned divisor of the dim,
    else pad the dim to a multiple of the smallest alignment and tile the padded dim."""
    if dim <= target:
        return dim, dim
    for a in aligns:
        b = _pick_block(dim, target, a)
        if b is not None:
            return b, dim
    a = aligns[-1]
    padded = -(-dim // a) * a
    return _pick_block(padded, target, a), padded


# --------------------------------------------------------------------------------------
# Wrapper
# --------------------------------------------------------------------------------------
def linear(x: jax.Array, weight: jax.Array, *, bm_target=None, bn_target=None,
           bk_target=None, bf16_mxu: bool = True) -> jax.Array:
    """y = einsum('... i, o i -> ... o', x, weight); weight is (out_features, in_features)."""
    orig_shape = x.shape
    K = orig_shape[-1]
    O, K_w = weight.shape
    assert K_w == K, "weight must be (out_features, in_features)"
    out_dtype = jnp.result_type(x.dtype, weight.dtype)

    x_item = jnp.dtype(x.dtype).itemsize
    w_item = jnp.dtype(weight.dtype).itemsize
    o_item = jnp.dtype(out_dtype).itemsize

    # ---- device-aware tile targets & VMEM budget --------------------------------------
    vmem_phys = _vmem_capacity_bytes()
    vmem_cap = (3 * vmem_phys) // 4                  # headroom for Mosaic internal scratch
    if vmem_phys <= 32 * 2 ** 20:                    # very small VMEM generations
        dm, dn, dk = 256, 256, 512
    elif vmem_phys <= 64 * 2 ** 20:                  # v7x: 64 MiB per TensorCore
        dm, dn, dk = 256, 256, 1024
    else:                                            # v5e / v6e: 128 MiB
        dm, dn, dk = 512, 512, 2048
    bm_target = bm_target or dm
    bn_target = bn_target or dn
    bk_target = bk_target or dk

    x2 = x.reshape(-1, K)
    M = x2.shape[0]

    # Row tile alignment is dtype dependent: (8,128) f32, (16,128) bf16, (32,128) int8.
    m_align = max(8, 32 // x_item)
    bm, Mp = _block_and_pad(M, bm_target, (m_align,))
    # N/K tiles aligned to 256 for the 2x256x256 MXU (128 fallback); pad odd dims instead
    # of falling back to huge unaligned full-extent blocks.
    bn, Op = _block_and_pad(O, bn_target, (256, 128))

    # Collapse K into a single block when the double-buffered (bm,K)/(K,bn) tiles fit:
    # removes the ~0.35us-per-step K grid loop and the accumulator read-modify-write.
    single_k_bytes = 2 * (bm * K * x_item + K * bn * w_item) + 2 * bm * bn * o_item
    if single_k_bytes <= int(0.6 * vmem_cap):
        bk, Kp = K, K
    else:
        bk, Kp = _block_and_pad(K, bk_target, (256, 128))

    grid_m, grid_n, grid_k = Mp // bm, Op // bn, Kp // bk

    # v7x has 2 TensorCores: keep at least one parallel axis with >= 2 blocks.
    if vmem_phys <= 64 * 2 ** 20 and grid_m == 1 and grid_n == 1 and bn % 256 == 0:
        bn //= 2
        grid_n = Op // bn

    # ---- pad operands (zero K padding contributes nothing; M/O padding is sliced off) --
    if Mp != M or Kp != K:
        x2 = jnp.pad(x2, ((0, Mp - M), (0, Kp - K)))
    # Pre-transposed (K, O) weight keeps the RHS contraction on the sublane axis.
    # TODO(synk): in a real model, hoist this transpose to parameter-load time.
    w_t = weight.T
    if Kp != K or Op != O:
        w_t = jnp.pad(w_t, ((0, Kp - K), (0, Op - O)))

    est_vmem = (2 * (bm * bk * x_item + bk * bn * w_item)
                + 2 * bm * bn * o_item
                + (bm * bn * 4 if grid_k > 1 else 0))
    vmem_limit = int(min(vmem_cap, max(32 * 2 ** 20, int(1.35 * est_vmem))))

    cost = pl.CostEstimate(
        flops=2 * M * O * K,
        transcendentals=0,
        bytes_accessed=M * K * x_item + O * K * w_item + M * O * o_item,
    )

    if grid_k == 1:
        kernel = functools.partial(_linear_kernel_single_k, bf16_mxu=bf16_mxu)
        grid_spec = pltpu.PrefetchScalarGridSpec(
            num_scalar_prefetch=0,
            grid=(grid_m, grid_n),
            in_specs=[
                pl.BlockSpec((bm, bk), lambda i, j: (i, 0)),     # x tile (bm, K)
                pl.BlockSpec((bk, bn), lambda i, j: (0, j)),     # w tile (K, bn)
            ],
            out_specs=pl.BlockSpec((bm, bn), lambda i, j: (i, j)),
        )
        dim_sem = ("parallel", "parallel")
    else:
        kernel = functools.partial(_linear_kernel_multi_k, bf16_mxu=bf16_mxu)
        grid_spec = pltpu.PrefetchScalarGridSpec(
            num_scalar_prefetch=0,
            grid=(grid_m, grid_n, grid_k),
            in_specs=[
                pl.BlockSpec((bm, bk), lambda i, j, k: (i, k)),  # x tile
                pl.BlockSpec((bk, bn), lambda i, j, k: (k, j)),  # w tile (pre-transposed)
            ],
            out_specs=pl.BlockSpec((bm, bn), lambda i, j, k: (i, j)),
            scratch_shapes=[pltpu.VMEM((bm, bn), jnp.float32)],
        )
        dim_sem = ("parallel", "parallel", "arbitrary")

    out = pl.pallas_call(
        kernel,
        out_shape=jax.ShapeDtypeStruct((Mp, Op), out_dtype),
        grid_spec=grid_spec,
        compiler_params=pltpu.CompilerParams(
            dimension_semantics=dim_sem,
            vmem_limit_bytes=vmem_limit,
        ),
        cost_estimate=cost,
    )(x2, w_t)

    if Mp != M or Op != O:
        out = out[:M, :O]
    return out.reshape(*orig_shape[:-1], O)


def linear_ref(x, weight):
    return jnp.einsum(
        "...i,oi->...o",
        x.astype(jnp.float32),
        weight.astype(jnp.float32),
        precision=jax.lax.Precision.HIGHEST,
    ).astype(jnp.result_type(x.dtype, weight.dtype))


if __name__ == "__main__":
    key = jax.random.PRNGKey(0)
    batch, seq, in_features, out_features = 2, 8, 128, 256

    kx, kw = jax.random.split(key)
    # Quantize inputs to bf16-representable values so the bf16-operand MXU path is exact
    # relative to the f32 reference (accumulation is f32 in both).
    x = jax.random.normal(kx, (batch, seq, in_features), dtype=jnp.float32)
    x = x.astype(jnp.bfloat16).astype(jnp.float32)

    # Same init as the module: trunc_normal(std=sqrt(2/(in+out)), clipped at +-3*std).
    std = math.sqrt(2.0 / (in_features + out_features))
    weight = std * jax.random.truncated_normal(
        kw, -3.0, 3.0, (out_features, in_features), dtype=jnp.float32
    )
    weight = weight.astype(jnp.bfloat16).astype(jnp.float32)

    out = linear(x, weight)
    out = jax.block_until_ready(out)

    ref = linear_ref(x, weight)
    assert out.shape == (batch, seq, out_features) and out.dtype == x.dtype
    assert jnp.allclose(out, ref, atol=1e-4, rtol=1e-4), "mismatch vs reference"
    print("KERNEL_OK")
</pallas_src>

<mosaic_0001>
module attributes {stable_mosaic.version = 11 : i64} {
  func.func @_linear_kernel_single_k(%arg0: i32, %arg1: i32, %arg2: memref<16x128xf32, #tpu.memory_space<vmem>>, %arg3: memref<128x256xf32, #tpu.memory_space<vmem>>, %arg4: memref<16x256xf32, #tpu.memory_space<vmem>>) attributes {dimension_semantics = [#tpu.dimension_semantics<parallel>, #tpu.dimension_semantics<parallel>], iteration_bounds = array<i64: 1, 1>, scalar_prefetch = 0 : i64, scratch_operands = 0 : i64, tpu.core_type = #tpu.core_type<tc>, window_params = [{transform_indices = @transform_0, window_bounds = array<i64: 16, 128>}, {transform_indices = @transform_1, window_bounds = array<i64: 128, 256>}, {transform_indices = @transform_2, window_bounds = array<i64: 16, 256>}]} {
    %c0 = arith.constant 0 : index
    %c0_0 = arith.constant 0 : index
    %0 = vector.load %arg2[%c0, %c0_0] : memref<16x128xf32, #tpu.memory_space<vmem>>, vector<16x128xf32>
    %1 = arith.truncf %0 : vector<16x128xf32> to vector<16x128xbf16>
    %c0_1 = arith.constant 0 : index
    %c0_2 = arith.constant 0 : index
    %2 = vector.load %arg3[%c0_1, %c0_2] : memref<128x256xf32, #tpu.memory_space<vmem>>, vector<128x256xf32>
    %3 = arith.truncf %2 : vector<128x256xf32> to vector<128x256xbf16>
    %cst = arith.constant dense<0.000000e+00> : vector<16x256xf32>
    %4 = tpu.matmul %1, %3, %cst {dimension_numbers = #tpu.dot_dimension_numbers<[1], [0], [0], [1], [0, 0, 1, 1], [], []>} : vector<16x128xbf16>, vector<128x256xbf16>, vector<16x256xf32> -> vector<16x256xf32>
    %c0_3 = arith.constant 0 : index
    %c0_4 = arith.constant 0 : index
    %5 = vector.load %arg4[%c0_3, %c0_4] : memref<16x256xf32, #tpu.memory_space<vmem>>, vector<16x256xf32>
    tpu.vector_store %arg4[%c0_3, %c0_4], %4 {strides = array<i32>} : memref<16x256xf32, #tpu.memory_space<vmem>>, vector<16x256xf32>,
    return
  }
  func.func @transform_0(%arg0: i32, %arg1: i32) -> (i32, i32) {
    %c0_i32 = arith.constant 0 : i32
    %c0_i32_0 = arith.constant 0 : i32
    return %arg0, %c0_i32 : i32, i32
  }
  func.func @transform_1(%arg0: i32, %arg1: i32) -> (i32, i32) {
    %c0_i32 = arith.constant 0 : i32
    %c0_i32_0 = arith.constant 0 : i32
    return %c0_i32, %arg1 : i32, i32
  }
  func.func @transform_2(%arg0: i32, %arg1: i32) -> (i32, i32) {
    %c0_i32 = arith.constant 0 : i32
    return %arg0, %arg1 : i32, i32
  }
}

</mosaic_0001>

<bundles_post_ra>
// kernel: tpu_custom_call.1
= control target key start
LH: loop header
LB: loop body
LE: loop exit
PB: predicated region body
PF: predicated region fallthrough
CT: control target
= control target key end

     0   :  { %7 = vsyncpa [#allocation3], 0  ;;  %s269_s0 = inlined_call_operand.hbm [shape: f32[16,128], index: 0, kind: input, shape index: {}]   ;;  %s270_s1 = inlined_call_operand.hbm [shape: f32[128,256], index: 1, kind: input, shape index: {}]   ;;  %s271_s2 = inlined_call_operand.hbm [shape: f32[16,256], index: 2, kind: output, shape index: {}]  }
   0x1   :  { %8 = vsyncpa [#allocation6], 0 }
   0x2   :  { %9 = vsyncpa [#allocation4], 0  ;;  %s14_s11 = sshll.u32 %s269_s0, 4  ;;  %s232_s12 = smov [#allocation2]   ;;  %s15_s11 = int_to_ptr.hbm [resolvable:$true] %s14_s11 }
   0x3   :  { %s16_s13 = sshll.u32 %s232_s12, 4  ;;  %s27_s16 = sshll.u32 %s270_s1, 4  ;;  %s17_s13 = int_to_ptr.vmem [resolvable:$true] %s16_s13  ;;  %s28_s16 = int_to_ptr.hbm [resolvable:$true] %s27_s16 }
   0x4   :  { %s233_s17 = smov 128   ;;  %s234_s18 = smov 8  }
   0x5   :  { %22 = dma.hbm_to_vmem [thread:$0]  %s15_s11, 256, %s17_s13, [#allocation3], %s233_s17, %s233_s17, %s234_s18  }
   0x6   :  { %s235_s19 = smov [#allocation5]   ;;  %s236_s21 = smov 256  }
   0x7   :  { %s29_s20 = sshll.u32 %s235_s19, 4  ;;  %s237_s22 = smov 16   ;;  %s30_s20 = int_to_ptr.vmem [resolvable:$true] %s29_s20 }
   0x8   :  { %35 = dma.hbm_to_vmem [thread:$0]  %s28_s16, 4096, %s30_s20, [#allocation6], %s236_s21, %s236_s21, %s237_s22  }
   0x9   :  { %226 = dma.done.wait [#allocation3], 256  }
   0xa   :  { %227 = vsyncadd [#allocation3], 4294967040 }
   0xb   :  { %228 = dma.done.wait [#allocation6], 4096  }
   0xc   :  { %229 = vsyncadd [#allocation6], 4294963200  ;;  %v75_v0 = vld [vmem:[#allocation5 + $0xe0] sm:$0xff]  ;;  %v77_v1 = vld [vmem:[#allocation5 + $0xf0] sm:$0xff]  ;;  %s238_s0 = smov [#allocation7]   ;;  %s133_s25 = sshll.u32 %s271_s2, 4  ;;  %s134_s25 = int_to_ptr.hbm [resolvable:$true] %s133_s25 }
   0xd   :  { %v76_v2 = vld [vmem:[#allocation5 + $0xe8] sm:$0xff]  ;;  %v93_v3 = vpack.c.bf16 %v77_v1, %v75_v0  ;;  %v78_v4 = vld [vmem:[#allocation5 + $0xf8] sm:$0xff]  ;;  %v71_v5 = vld [vmem:[#allocation5 + $0xc0] sm:$0xff]  ;;  %s131_s1 = sshll.u32 %s238_s0, 4  ;;  %s132_s1 = int_to_ptr.vmem [resolvable:$true] %s131_s1 }
   0xe   :  { %v73_v6 = vld [vmem:[#allocation5 + $0xd0] sm:$0xff]  ;;  %v94_v7 = vpack.c.bf16 %v78_v4, %v76_v2  ;;  %v72_v8 = vld [vmem:[#allocation5 + $0xc8] sm:$0xff]  ;;  %v74_v9 = vld [vmem:[#allocation5 + $0xd8] sm:$0xff] }
   0xf   :  { %95 = vmatpush.bf16.msra.mxu0 %v93_v3  ;;  %v91_v10 = vpack.c.bf16 %v73_v6, %v71_v5  ;;  %v92_v11 = vpack.c.bf16 %v74_v9, %v72_v8  ;;  %v67_v12 = vld [vmem:[#allocation5 + $0xa0] sm:$0xff]  ;;  %v69_v13 = vld [vmem:[#allocation5 + $0xb0] sm:$0xff]  ;;  %v68_v14 = vld [vmem:[#allocation5 + $0xa8] sm:$0xff] }
  0x10   :  { %109 = vmatpush.bf16.msra.mxu1 %v94_v7  ;;  %v70_v15 = vld [vmem:[#allocation5 + $0xb8] sm:$0xff]  ;;  %v89_v16 = vpack.c.bf16 %v69_v13, %v67_v12  ;;  %v63_v18 = vld [vmem:[#allocation5 + $0x80] sm:$0xff]  ;;  %v65_v19 = vld [vmem:[#allocation5 + $0x90] sm:$0xff] }
  0x11   :  { %v90_v17 = vpack.c.bf16 %v70_v15, %v68_v14  ;;  %v64_v20 = vld [vmem:[#allocation5 + $0x88] sm:$0xff]  ;;  %v66_v21 = vld [vmem:[#allocation5 + $0x98] sm:$0xff]  ;;  %v87_v22 = vpack.c.bf16 %v65_v19, %v63_v18  ;;  %v59_v24 = vld [vmem:[#allocation5 + $0x60] sm:$0xff] }
  0x12   :  { %v88_v23 = vpack.c.bf16 %v66_v21, %v64_v20  ;;  %v61_v25 = vld [vmem:[#allocation5 + $0x70] sm:$0xff]  ;;  %v60_v26 = vld [vmem:[#allocation5 + $0x68] sm:$0xff]  ;;  %v62_v27 = vld [vmem:[#allocation5 + $0x78] sm:$0xff] }
  0x13   :  { %96 = vmatpush.bf16.msra.mxu0 %v91_v10  ;;  %v85_v28 = vpack.c.bf16 %v61_v25, %v59_v24  ;;  %v86_v29 = vpack.c.bf16 %v62_v27, %v60_v26  ;;  %v55_v30 = vld [vmem:[#allocation5 + $0x40] sm:$0xff]  ;;  %v57_v31 = vld [vmem:[#allocation5 + $0x50] sm:$0xff]  ;;  %v56_v32 = vld [vmem:[#allocation5 + $0x48] sm:$0xff] }
  0x14   :  { %110 = vmatpush.bf16.msra.mxu1 %v92_v11  ;;  %v58_v33 = vld [vmem:[#allocation5 + $0x58] sm:$0xff]  ;;  %v83_v34 = vpack.c.bf16 %v57_v31, %v55_v30  ;;  %v51_v36 = vld [vmem:[#allocation5 + $0x20] sm:$0xff]  ;;  %v53_v37 = vld [vmem:[#allocation5 + $0x30] sm:$0xff] }
  0x15   :  { %v84_v35 = vpack.c.bf16 %v58_v33, %v56_v32  ;;  %v52_v38 = vld [vmem:[#allocation5 + $0x28] sm:$0xff]  ;;  %v54_v39 = vld [vmem:[#allocation5 + $0x38] sm:$0xff]  ;;  %v81_v40 = vpack.c.bf16 %v53_v37, %v51_v36  ;;  %v47_v42 = vld [vmem:[#allocation5] sm:$0xff] }
  0x16   :  { %v82_v41 = vpack.c.bf16 %v54_v39, %v52_v38  ;;  %v49_v43 = vld [vmem:[#allocation5 + $0x10] sm:$0xff]  ;;  %v48_v44 = vld [vmem:[#allocation5 + $0x8] sm:$0xff]  ;;  %v50_v45 = vld [vmem:[#allocation5 + $0x18] sm:$0xff] }
  0x17   :  { %97 = vmatpush.bf16.msra.mxu0 %v89_v16  ;;  %v79_v46 = vpack.c.bf16 %v49_v43, %v47_v42  ;;  %v44_v47 = vld [vmem:[#allocation2] sm:$0xff]  ;;  %v45_v48 = vld [vmem:[#allocation2 + $0x8] sm:$0xff]  ;;  %v80_v49 = vpack.c.bf16 %v50_v45, %v48_v44 }
  0x18   :  { %111 = vmatpush.bf16.msra.mxu1 %v90_v17  ;;  %v46_v50 = vpack.c.bf16 %v45_v48, %v44_v47 }
  0x1b   :  { %98 = vmatpush.bf16.msra.mxu0 %v87_v22 }
  0x1c   :  { %112 = vmatpush.bf16.msra.mxu1 %v88_v23 }
  0x1f   :  { %99 = vmatpush.bf16.msra.mxu0 %v85_v28 }
  0x20   :  { %113 = vmatpush.bf16.msra.mxu1 %v86_v29 }
  0x23   :  { %100 = vmatpush.bf16.msra.mxu0 %v83_v34 }
  0x24   :  { %114 = vmatpush.bf16.msra.mxu1 %v84_v35 }
  0x27   :  { %101 = vmatpush.bf16.msra.mxu0 %v81_v40 }
  0x28   :  { %115 = vmatpush.bf16.msra.mxu1 %v82_v41 }
  0x2b   :  { %102 = vmatpush.bf16.msra.mxu0 %v79_v46 }
  0x2c   :  { %116 = vmatpush.bf16.msra.mxu1 %v80_v49 }
  0x2e   :  { %103 = vmatmul.bf16.vlgmr.msra.gmra.mxu0 %v46_v50 }
  0x2f   :  { %117 = vmatmul.bf16.vlgmr.msra.gmra.mxu1 %v46_v50 }
  0xab   :  { %v104_v51 = vpop.f32.mrf.mxu0 }
  0xac   :  { %123 = vst [vmem:[#allocation7] sm:$0xff] %v104_v51  ;;  %v118_v52 = vpop.f32.mrf.mxu1 }
  0xad   :  { %124 = vst [vmem:[#allocation7 + $0x8] sm:$0xff] %v118_v52 }
  0xb3   :  { %v106_v53 = vpop.f32.mrf.mxu0 }
  0xb4   :  { %125 = vst [vmem:[#allocation7 + $0x10] sm:$0xff] %v106_v53  ;;  %v120_v54 = vpop.f32.mrf.mxu1 }
  0xb5   :  { %126 = vst [vmem:[#allocation7 + $0x18] sm:$0xff] %v120_v54 }
  0xb6   :  { %139 = dma.vmem_to_hbm [thread:$0]  %s132_s1, 512, %s134_s25, [#allocation4], %s236_s21, %s236_s21, %s237_s22  }
  0xb7   :  { %230 = dma.done.wait [#allocation4], 512  }
  0xb8   :  { %231 = vsyncadd [#allocation4], 4294966784 }
  0xb9   :  { %144 = vsyncpa [#allocation3], 1 }
  0xba   :  { %145 = vsyncpa [#allocation6], 1 }
  0xbb   :  { %146 = vsyncpa [#allocation4], 1 }

</bundles_post_ra>
